<compile_context>
chip_gen: v7x
topology: tpu7x:2x2x1
jax: 0.10.0
libtpu: 0.0.40
codegen_flags: <defaults>
</compile_context>

<pallas_src>
import functools

import jax
import jax.numpy as jnp
from jax.experimental import pallas as pl
from jax.experimental.pallas import tpu as pltpu


def _round_up(n, m):
    return ((n + m - 1) // m) * m


def _cdiv(a, b):
    return (a + b - 1) // b


def _vmem_capacity_bytes():
    try:
        cap = int(getattr(pltpu.get_tpu_info(), "vmem_capacity_bytes", 0))
        if cap > 0:
            return cap
    except Exception:
        pass
    return 64 << 20  # conservative fallback (v7x per-TC VMEM)


def _maybe_buffered_spec(block_shape, index_map):
    """Resident block: constant index_map -> single buffer (no double buffering)."""
    try:
        return pl.BlockSpec(block_shape, index_map, pipeline_mode=pl.Buffered(1))
    except TypeError:  # older jax without pipeline_mode kwarg
        return pl.BlockSpec(block_shape, index_map)


# --------------------------- kernels ---------------------------

def _resident_kernel(x_ref, w1_ref, b1_ref, w2_ref, b2_ref, w3_ref, b3_ref,
                     o_ref, *, mxu_dtype):
    """Weights fully VMEM-resident; one row tile of x per grid step."""
    x = x_ref[...]
    w1, w2, w3 = w1_ref[...], w2_ref[...], w3_ref[...]
    if mxu_dtype is not None:
        x = x.astype(mxu_dtype)
        w1 = w1.astype(mxu_dtype)
        w2 = w2.astype(mxu_dtype)
        w3 = w3.astype(mxu_dtype)

    # Gate + up projections: MXU dots, f32 accumulation, f32 biases.
    x1 = jnp.dot(x, w1, preferred_element_type=jnp.float32) + b1_ref[...]
    x2 = jnp.dot(x, w2, preferred_element_type=jnp.float32) + b2_ref[...]
    hidden = (x1 * jax.nn.sigmoid(x1)) * x2          # SiLU gate in f32 (VPU + EUP)

    out = jnp.dot(hidden.astype(w3.dtype), w3, preferred_element_type=jnp.float32)
    o_ref[...] = (out + b3_ref[...]).astype(o_ref.dtype)


def _tiled_kernel(x_ref, w1_ref, b1_ref, w2_ref, b2_ref, w3_ref, b3_ref,
                  o_ref, acc_ref, *, mxu_dtype):
    """Hidden-dim (K) tiled path: grid=(row tiles, H tiles), f32 accumulator."""
    h = pl.program_id(1)

    @pl.when(h == 0)
    def _():
        acc_ref[...] = jnp.zeros_like(acc_ref)

    x = x_ref[...]
    w1, w2, w3 = w1_ref[...], w2_ref[...], w3_ref[...]
    if mxu_dtype is not None:
        x = x.astype(mxu_dtype)
        w1 = w1.astype(mxu_dtype)
        w2 = w2.astype(mxu_dtype)
        w3 = w3.astype(mxu_dtype)

    x1 = jnp.dot(x, w1, preferred_element_type=jnp.float32) + b1_ref[...]
    x2 = jnp.dot(x, w2, preferred_element_type=jnp.float32) + b2_ref[...]
    hidden = (x1 * jax.nn.sigmoid(x1)) * x2

    acc_ref[...] += jnp.dot(hidden.astype(w3.dtype), w3,
                            preferred_element_type=jnp.float32)

    @pl.when(h == pl.num_programs(1) - 1)
    def _():
        o_ref[...] = (acc_ref[...] + b3_ref[...]).astype(o_ref.dtype)


# --------------------------- wrapper ---------------------------

def swiglu(x, w1, b1, w2, b2, w3, b3, *, tm=256, th=512,
           mxu_dtype=None, force_path=None):
    """x: (M, d_in); w1/w2: (d_in, H); b1/b2: (1, H); w3: (H, d_out); b3: (1, d_out).

    mxu_dtype: optional dtype (e.g. jnp.bfloat16) for MXU operands on f32 inputs.
    force_path: None (auto) | "resident" | "tiled".
    """
    M, d_in = x.shape
    H = w1.shape[1]
    d_out = w3.shape[1]
    out_dtype = x.dtype

    # Biases are tiny; keep them in f32 so the kernel adds them with no casts.
    b1 = b1.astype(jnp.float32).reshape(1, H)
    b2 = b2.astype(jnp.float32).reshape(1, H)
    b3 = b3.astype(jnp.float32).reshape(1, d_out)

    # Row tiling (no padding of x; Pallas masks the trailing partial block).
    tm = max(8, (tm // 8) * 8)
    tm_eff = min(tm, _round_up(M, 8))
    # Ensure >=2 row tiles when M is large enough so v7x's 2 TCs both get work.
    while tm_eff > 128 and _cdiv(M, tm_eff) < 2:
        tm_eff = max(128, (tm_eff // 2 // 8) * 8)
    n_m = _cdiv(M, tm_eff)

    itemsize = jnp.dtype(x.dtype).itemsize
    w_isz = jnp.dtype(w1.dtype).itemsize
    mxu_isz = jnp.dtype(mxu_dtype).itemsize if mxu_dtype is not None else w_isz
    nbytes = lambda a: a.size * jnp.dtype(a.dtype).itemsize

    cap = _vmem_capacity_bytes()
    budget = int(cap * 85 // 100)          # ~108 MiB on v5e/v6e, ~54 MiB on v7x
    headroom = 4 << 20

    # Resident-path VMEM requirement (Buffered(1) weights -> no 2x on residents).
    resident = (nbytes(w1) + nbytes(w2) + nbytes(w3)
                + nbytes(b1) + nbytes(b2) + nbytes(b3))
    io_stream = 2 * tm_eff * d_in * itemsize + 2 * tm_eff * d_out * itemsize
    interm = 3 * tm_eff * H * 4 + tm_eff * d_out * 4 + tm_eff * H * mxu_isz
    if mxu_dtype is not None:
        interm += tm_eff * d_in * mxu_isz
    resident_need = resident + io_stream + interm + headroom

    use_tiled = (force_path == "tiled") or (force_path != "resident"
                                            and resident_need > budget)
    if use_tiled and H % 128 != 0:
        # K-tiling needs lane-aligned hidden tiles; fall back to best effort.
        # TODO(synk): pad H to a multiple of 128 at parameter-load time instead.
        use_tiled = False

    flops = 2 * M * d_in * (2 * H) + 2 * M * H * d_out + 4 * M * H
    cost = pl.CostEstimate(
        flops=flops,
        transcendentals=M * H,
        bytes_accessed=int(nbytes(x) + resident
                           + M * d_out * jnp.dtype(out_dtype).itemsize),
    )

    if not use_tiled:
        vmem_limit = int(min(max(resident_need, 32 << 20), budget))
        kernel = functools.partial(_resident_kernel, mxu_dtype=mxu_dtype)
        full = lambda i: (0, 0)
        return pl.pallas_call(
            kernel,
            out_shape=jax.ShapeDtypeStruct((M, d_out), out_dtype),
            grid_spec=pltpu.PrefetchScalarGridSpec(
                num_scalar_prefetch=0,
                grid=(n_m,),
                in_specs=[
                    pl.BlockSpec((tm_eff, d_in), lambda i: (i, 0)),   # x row tile
                    _maybe_buffered_spec((d_in, H), full),            # w1 (resident)
                    _maybe_buffered_spec((1, H), full),               # b1
                    _maybe_buffered_spec((d_in, H), full),            # w2 (resident)
                    _maybe_buffered_spec((1, H), full),               # b2
                    _maybe_buffered_spec((H, d_out), full),           # w3 (resident)
                    _maybe_buffered_spec((1, d_out), full),           # b3
                ],
                out_specs=pl.BlockSpec((tm_eff, d_out), lambda i: (i, 0)),
            ),
            compiler_params=pltpu.CompilerParams(
                dimension_semantics=("parallel",),
                vmem_limit_bytes=vmem_limit),
            cost_estimate=cost,
        )(x, w1, b1, w2, b2, w3, b3)

    # ------------------ K-tiled path (large weights / v7x) ------------------
    # Largest hidden tile that is a multiple of 128 and divides H, <= th.
    t = (min(th, H) // 128) * 128
    th_eff = 128
    while t >= 128:
        if H % t == 0:
            th_eff = t
            break
        t -= 128
    n_h = H // th_eff

    stream = (2 * tm_eff * d_in * itemsize            # x (double-buffered)
              + 2 * 2 * d_in * th_eff * w_isz         # w1, w2 column tiles
              + 2 * th_eff * d_out * w_isz            # w3 row tile
              + 2 * 2 * th_eff * 4                    # b1, b2 tiles
              + d_out * 4                             # b3 (Buffered(1))
              + 2 * tm_eff * d_out * itemsize)        # out tile
    scratch = tm_eff * d_out * 4                      # f32 accumulator
    interm_t = 3 * tm_eff * th_eff * 4 + tm_eff * th_eff * mxu_isz + tm_eff * d_out * 4
    if mxu_dtype is not None:
        interm_t += tm_eff * d_in * mxu_isz
    vmem_limit = int(min(max(stream + scratch + interm_t + headroom, 32 << 20),
                         budget))

    kernel = functools.partial(_tiled_kernel, mxu_dtype=mxu_dtype)
    return pl.pallas_call(
        kernel,
        out_shape=jax.ShapeDtypeStruct((M, d_out), out_dtype),
        grid_spec=pltpu.PrefetchScalarGridSpec(
            num_scalar_prefetch=0,
            grid=(n_m, n_h),
            in_specs=[
                pl.BlockSpec((tm_eff, d_in), lambda i, h: (i, 0)),    # x (reused along h)
                pl.BlockSpec((d_in, th_eff), lambda i, h: (0, h)),    # w1 column tile
                pl.BlockSpec((1, th_eff), lambda i, h: (0, h)),       # b1 tile
                pl.BlockSpec((d_in, th_eff), lambda i, h: (0, h)),    # w2 column tile
                pl.BlockSpec((1, th_eff), lambda i, h: (0, h)),       # b2 tile
                pl.BlockSpec((th_eff, d_out), lambda i, h: (h, 0)),   # w3 row tile
                _maybe_buffered_spec((1, d_out), lambda i, h: (0, 0)),  # b3 (resident)
            ],
            out_specs=pl.BlockSpec((tm_eff, d_out), lambda i, h: (i, 0)),
            scratch_shapes=[pltpu.VMEM((tm_eff, d_out), jnp.float32)],
        ),
        compiler_params=pltpu.CompilerParams(
            dimension_semantics=("parallel", "arbitrary"),
            vmem_limit_bytes=vmem_limit),
        cost_estimate=cost,
    )(x, w1, b1, w2, b2, w3, b3)


def swiglu_reference(x, w1, b1, w2, b2, w3, b3):
    x1 = x @ w1 + b1
    x2 = x @ w2 + b2
    h = jax.nn.silu(x1) * x2
    return h @ w3 + b3


if __name__ == "__main__":
    key = jax.random.PRNGKey(0)
    keys = jax.random.split(key, 8)

    # --- Config 1: module defaults SwiGLU(in=32, hidden=64), resident path ---
    batch, seq = 2, 8
    in_features, hidden_features = 32, 64
    out_features = in_features

    x = jax.random.normal(keys[0], (batch, seq, in_features), jnp.float32)
    w1 = jax.random.normal(keys[1], (in_features, hidden_features), jnp.float32) * 0.05
    b1 = jax.random.normal(keys[2], (1, hidden_features), jnp.float32) * 0.01
    w2 = jax.random.normal(keys[3], (in_features, hidden_features), jnp.float32) * 0.05
    b2 = jax.random.normal(keys[4], (1, hidden_features), jnp.float32) * 0.01
    w3 = jax.random.normal(keys[5], (hidden_features, out_features), jnp.float32) * 0.05
    b3 = jax.random.normal(keys[6], (1, out_features), jnp.float32) * 0.01

    x2d = x.reshape(batch * seq, in_features)
    out2d = swiglu(x2d, w1, b1, w2, b2, w3, b3)
    out = out2d.reshape(batch, seq, out_features)
    jax.block_until_ready(out)

    ref = swiglu_reference(x2d, w1, b1, w2, b2, w3, b3).reshape(batch, seq, out_features)
    assert out.shape == (batch, seq, out_features)
    assert jnp.allclose(out, ref, atol=1e-5, rtol=1e-5), "resident path mismatch"

    # --- Config 2: K-tiled fallback path (v7x big-weight case) with a
    #     non-tile-multiple token count (partial trailing row block, no padding).
    M2, d_in2, H2, d_out2 = 300, 128, 256, 128
    k2 = jax.random.split(keys[7], 7)
    x_b = jax.random.normal(k2[0], (M2, d_in2), jnp.float32)
    w1_b = jax.random.normal(k2[1], (d_in2, H2), jnp.float32) * 0.03
    b1_b = jax.random.normal(k2[2], (1, H2), jnp.float32) * 0.01
    w2_b = jax.random.normal(k2[3], (d_in2, H2), jnp.float32) * 0.03
    b2_b = jax.random.normal(k2[4], (1, H2), jnp.float32) * 0.01
    w3_b = jax.random.normal(k2[5], (H2, d_out2), jnp.float32) * 0.03
    b3_b = jax.random.normal(k2[6], (1, d_out2), jnp.float32) * 0.01

    out_b = swiglu(x_b, w1_b, b1_b, w2_b, b2_b, w3_b, b3_b,
                   force_path="tiled", th=128)
    jax.block_until_ready(out_b)
    ref_b = swiglu_reference(x_b, w1_b, b1_b, w2_b, b2_b, w3_b, b3_b)
    assert out_b.shape == (M2, d_out2)
    assert jnp.allclose(out_b, ref_b, atol=1e-4, rtol=1e-4), "tiled path mismatch"

    print("KERNEL_OK")
</pallas_src>

<mosaic_0001>
module attributes {stable_mosaic.version = 11 : i64} {
  func.func @_resident_kernel(%arg0: i32, %arg1: memref<16x32xf32, #tpu.memory_space<vmem>>, %arg2: memref<32x64xf32, #tpu.memory_space<vmem>>, %arg3: memref<1x64xf32, #tpu.memory_space<vmem>>, %arg4: memref<32x64xf32, #tpu.memory_space<vmem>>, %arg5: memref<1x64xf32, #tpu.memory_space<vmem>>, %arg6: memref<64x32xf32, #tpu.memory_space<vmem>>, %arg7: memref<1x32xf32, #tpu.memory_space<vmem>>, %arg8: memref<16x32xf32, #tpu.memory_space<vmem>>) attributes {dimension_semantics = [#tpu.dimension_semantics<parallel>], iteration_bounds = array<i64: 1>, scalar_prefetch = 0 : i64, scratch_operands = 0 : i64, tpu.core_type = #tpu.core_type<tc>, window_params = [{transform_indices = @transform_0, window_bounds = array<i64: 16, 32>}, {pipeline_mode = #tpu.pipeline_mode<synchronous>, transform_indices = @transform_1, window_bounds = array<i64: 32, 64>}, {pipeline_mode = #tpu.pipeline_mode<synchronous>, transform_indices = @transform_2, window_bounds = array<i64: 1, 64>}, {pipeline_mode = #tpu.pipeline_mode<synchronous>, transform_indices = @transform_3, window_bounds = array<i64: 32, 64>}, {pipeline_mode = #tpu.pipeline_mode<synchronous>, transform_indices = @transform_4, window_bounds = array<i64: 1, 64>}, {pipeline_mode = #tpu.pipeline_mode<synchronous>, transform_indices = @transform_5, window_bounds = array<i64: 64, 32>}, {pipeline_mode = #tpu.pipeline_mode<synchronous>, transform_indices = @transform_6, window_bounds = array<i64: 1, 32>}, {transform_indices = @transform_7, window_bounds = array<i64: 16, 32>}]} {
    %c0 = arith.constant 0 : index
    %c0_0 = arith.constant 0 : index
    %0 = vector.load %arg1[%c0, %c0_0] : memref<16x32xf32, #tpu.memory_space<vmem>>, vector<16x32xf32>
    %c0_1 = arith.constant 0 : index
    %c0_2 = arith.constant 0 : index
    %1 = vector.load %arg2[%c0_1, %c0_2] : memref<32x64xf32, #tpu.memory_space<vmem>>, vector<32x64xf32>
    %c0_3 = arith.constant 0 : index
    %c0_4 = arith.constant 0 : index
    %2 = vector.load %arg4[%c0_3, %c0_4] : memref<32x64xf32, #tpu.memory_space<vmem>>, vector<32x64xf32>
    %c0_5 = arith.constant 0 : index
    %c0_6 = arith.constant 0 : index
    %3 = vector.load %arg6[%c0_5, %c0_6] : memref<64x32xf32, #tpu.memory_space<vmem>>, vector<64x32xf32>
    %cst = arith.constant dense<0.000000e+00> : vector<16x64xf32>
    %4 = tpu.matmul %0, %1, %cst {dimension_numbers = #tpu.dot_dimension_numbers<[1], [0], [0], [1], [0, 0, 1, 1], [], []>} : vector<16x32xf32>, vector<32x64xf32>, vector<16x64xf32> -> vector<16x64xf32>
    %c0_7 = arith.constant 0 : index
    %c0_8 = arith.constant 0 : index
    %5 = vector.load %arg3[%c0_7, %c0_8] : memref<1x64xf32, #tpu.memory_space<vmem>>, vector<1x64xf32>
    %6 = vector.broadcast %5 : vector<1x64xf32> to vector<16x64xf32>
    %7 = arith.addf %4, %6 : vector<16x64xf32>
    %cst_9 = arith.constant dense<0.000000e+00> : vector<16x64xf32>
    %8 = tpu.matmul %0, %2, %cst_9 {dimension_numbers = #tpu.dot_dimension_numbers<[1], [0], [0], [1], [0, 0, 1, 1], [], []>} : vector<16x32xf32>, vector<32x64xf32>, vector<16x64xf32> -> vector<16x64xf32>
    %c0_10 = arith.constant 0 : index
    %c0_11 = arith.constant 0 : index
    %9 = vector.load %arg5[%c0_10, %c0_11] : memref<1x64xf32, #tpu.memory_space<vmem>>, vector<1x64xf32>
    %10 = vector.broadcast %9 : vector<1x64xf32> to vector<16x64xf32>
    %11 = arith.addf %8, %10 : vector<16x64xf32>
    %12 = arith.negf %7 : vector<16x64xf32>
    %13 = math.exp %12 : vector<16x64xf32>
    %cst_12 = arith.constant 1.000000e+00 : f32
    %14 = vector.broadcast %cst_12 : f32 to vector<16x64xf32>
    %15 = arith.addf %14, %13 : vector<16x64xf32>
    %16 = arith.divf %14, %15 : vector<16x64xf32>
    %17 = arith.mulf %7, %16 : vector<16x64xf32>
    %18 = arith.mulf %17, %11 : vector<16x64xf32>
    %cst_13 = arith.constant dense<0.000000e+00> : vector<16x32xf32>
    %19 = tpu.matmul %18, %3, %cst_13 {dimension_numbers = #tpu.dot_dimension_numbers<[1], [0], [0], [1], [0, 0, 1, 1], [], []>} : vector<16x64xf32>, vector<64x32xf32>, vector<16x32xf32> -> vector<16x32xf32>
    %c0_14 = arith.constant 0 : index
    %c0_15 = arith.constant 0 : index
    %20 = vector.load %arg7[%c0_14, %c0_15] : memref<1x32xf32, #tpu.memory_space<vmem>>, vector<1x32xf32>
    %21 = vector.broadcast %20 : vector<1x32xf32> to vector<16x32xf32>
    %22 = arith.addf %19, %21 : vector<16x32xf32>
    %c0_16 = arith.constant 0 : index
    %c0_17 = arith.constant 0 : index
    %23 = vector.load %arg8[%c0_16, %c0_17] : memref<16x32xf32, #tpu.memory_space<vmem>>, vector<16x32xf32>
    tpu.vector_store %arg8[%c0_16, %c0_17], %22 {strides = array<i32>} : memref<16x32xf32, #tpu.memory_space<vmem>>, vector<16x32xf32>,
    return
  }
  func.func @transform_0(%arg0: i32) -> (i32, i32) {
    %c0_i32 = arith.constant 0 : i32
    %c0_i32_0 = arith.constant 0 : i32
    return %arg0, %c0_i32 : i32, i32
  }
  func.func @transform_1(%arg0: i32) -> (i32, i32) {
    %c0_i32 = arith.constant 0 : i32
    %c0_i32_0 = arith.constant 0 : i32
    %c0_i32_1 = arith.constant 0 : i32
    return %c0_i32, %c0_i32_0 : i32, i32
  }
  func.func @transform_2(%arg0: i32) -> (i32, i32) {
    %c0_i32 = arith.constant 0 : i32
    %c0_i32_0 = arith.constant 0 : i32
    %c0_i32_1 = arith.constant 0 : i32
    return %c0_i32, %c0_i32_0 : i32, i32
  }
  func.func @transform_3(%arg0: i32) -> (i32, i32) {
    %c0_i32 = arith.constant 0 : i32
    %c0_i32_0 = arith.constant 0 : i32
    %c0_i32_1 = arith.constant 0 : i32
    return %c0_i32, %c0_i32_0 : i32, i32
  }
  func.func @transform_4(%arg0: i32) -> (i32, i32) {
    %c0_i32 = arith.constant 0 : i32
    %c0_i32_0 = arith.constant 0 : i32
    %c0_i32_1 = arith.constant 0 : i32
    return %c0_i32, %c0_i32_0 : i32, i32
  }
  func.func @transform_5(%arg0: i32) -> (i32, i32) {
    %c0_i32 = arith.constant 0 : i32
    %c0_i32_0 = arith.constant 0 : i32
    %c0_i32_1 = arith.constant 0 : i32
    return %c0_i32, %c0_i32_0 : i32, i32
  }
  func.func @transform_6(%arg0: i32) -> (i32, i32) {
    %c0_i32 = arith.constant 0 : i32
    %c0_i32_0 = arith.constant 0 : i32
    %c0_i32_1 = arith.constant 0 : i32
    return %c0_i32, %c0_i32_0 : i32, i32
  }
  func.func @transform_7(%arg0: i32) -> (i32, i32) {
    %c0_i32 = arith.constant 0 : i32
    %c0_i32_0 = arith.constant 0 : i32
    return %arg0, %c0_i32 : i32, i32
  }
}

</mosaic_0001>

<bundles_post_ra>
// kernel: tpu_custom_call.1
= control target key start
LH: loop header
LB: loop body
LE: loop exit
PB: predicated region body
PF: predicated region fallthrough
CT: control target
= control target key end

     0   :  { %vm52_vm0 = vcmask 261120   ;;  %s604_s0 = inlined_call_operand.vmem [shape: f32[16,32], index: 0, kind: input, shape index: {}]   ;;  %s605_s1 = inlined_call_operand.vmem [shape: f32[32,64], index: 1, kind: input, shape index: {}]   ;;  %s606_s2 = inlined_call_operand.vmem [shape: f32[1,64], index: 2, kind: input, shape index: {}]   ;;  %s607_s3 = inlined_call_operand.vmem [shape: f32[32,64], index: 3, kind: input, shape index: {}]   ;;  %s608_s4 = inlined_call_operand.vmem [shape: f32[1,64], index: 4, kind: input, shape index: {}]   ;;  %s609_s5 = inlined_call_operand.vmem [shape: f32[64,32], index: 5, kind: input, shape index: {}]   ;;  %s610_s6 = inlined_call_operand.vmem [shape: f32[1,32], index: 6, kind: input, shape index: {}]   ;;  %s611_s7 = inlined_call_operand.hbm [shape: f32[16,32], index: 7, kind: output, shape index: {}]  }
   0x1   :  { %v29_v0 = vld [vmem:[%s605_s1] sm:$0xff]  ;;  %v30_v1 = vld [vmem:[%s605_s1 + $0x8] sm:$0xff]  ;;  %v31_v2 = vld [vmem:[%s605_s1 + $0x10] sm:$0xff] }
   0x2   :  { %v413_v3 = vpack.c.bf16 %v30_v1, %v29_v0  ;;  %v32_v4 = vld [vmem:[%s605_s1 + $0x18] sm:$0xff]  ;;  %v27_v5 = vld [vmem:[%s604_s0] sm:$0xff]  ;;  %v34_v8 = vld [vmem:[%s607_s3 + $0x8] sm:$0xff] }
   0x3   :  { %v417_v6 = vpack.c.bf16 %v32_v4, %v31_v2  ;;  %380 = vmatprep.mubr.msk.f32.mxu1 %vm52_vm0, %v27_v5  ;;  %v33_v7 = vld [vmem:[%s607_s3] sm:$0xff] }
   0x4   :  { %414 = vmatprep.subr.bf16.mxu1 %v413_v3 }
   0x5   :  { %12 = vsyncpa [#allocation3], 0  ;;  %416 = vmatpush3.bf16.msra.mxu1 %v413_v3  ;;  %v421_v9 = vpack.c.bf16 %v34_v8, %v33_v7  ;;  %v35_v10 = vld [vmem:[%s607_s3 + $0x10] sm:$0xff]  ;;  %v36_v11 = vld [vmem:[%s607_s3 + $0x18] sm:$0xff]  ;;  %vm239_vm1 = vcmask 523264   ;;  %s480_s1 = smov [#allocation2]  }
   0x6   :  { %418 = vmatprep.subr.bf16.mxu1 %v417_v6  ;;  %v28_v12 = vld [vmem:[%s604_s0 + $0x8] sm:$0xff]  ;;  %v425_v13 = vpack.c.bf16 %v36_v11, %v35_v10  ;;  %v37_v14 = vld [vmem:[%s609_s5] sm:$0xff]  ;;  %v39_v17 = vld [vmem:[%s609_s5 + $0x10] sm:$0xff]  ;;  %s328_s15 = sshll.u32 %s480_s1, 4  ;;  %s329_s15 = int_to_ptr.vmem [resolvable:$true] %s328_s15 }
   0x7   :  { %v38_v15 = vld [vmem:[%s609_s5 + $0x8] sm:$0xff]  ;;  %v40_v18 = vld [vmem:[%s609_s5 + $0x18] sm:$0xff]  ;;  %v41_v20 = vld [vmem:[%s609_s5 + $0x20] sm:$0xff]  ;;  %p461_p1 = scmp.lt.s32.totalorder %s329_s15, %s329_s15 }
   0x8   :  { %v429_v16 = vpack.c.bf16 %v38_v15, %v37_v14  ;;  %v433_v19 = vpack.c.bf16 %v40_v18, %v39_v17  ;;  %v42_v21 = vld [vmem:[%s609_s5 + $0x28] sm:$0xff]  ;;  %v43_v23 = vld [vmem:[%s609_s5 + $0x30] sm:$0xff]  ;;  %v44_v24 = vld [vmem:[%s609_s5 + $0x38] sm:$0xff] }
   0x9   :  { %420 = vmatpush3.bf16.msra.mxu1 %v417_v6  ;;  %v437_v22 = vpack.c.bf16 %v42_v21, %v41_v20  ;;  %v441_v25 = vpack.c.bf16 %v44_v24, %v43_v23  ;;  %v339_v26 = vld [vmem:[%s606_s2] ss:$0 sm:$0xff] }
   0xa   :  { %422 = vmatprep.subr.bf16.mxu1 %v421_v9  ;;  %430 = vmatprep.subr.bf16.mxu0 %v429_v16  ;;  %v342_v39 = vld [vmem:[%s608_s4] ss:$0 sm:$0xff]  ;;  %s456_s4 = scalar_lea.vmem %s329_s15, 256 }
   0xb   :  { %432 = vmatpush3.bf16.msra.mxu0 %v429_v16  ;;  %v347_v48 = vld [vmem:[%s610_s6] ss:$0 sm:$0xff]  ;;  %p457_p0 = scmp.ne.s32.totalorder %s329_s15, %s456_s4  ;;  %p462_p2 = scmp.lt.s32.totalorder %s456_s4, %s456_s4 }
   0xc   :  { %381 = vmatmul.mubr.msk.f32.vlgmr.msra.gmra.mrb[0].mxu1 %vm52_vm0, %v28_v12  ;;  %434 = vmatprep.subr.bf16.mxu0 %v433_v19 }
   0xd   :  { %424 = vmatpush3.bf16.msra.mxu1 %v421_v9  ;;  %391 = vmatprep.mubr.msk.f32.mxu1 %vm52_vm0, %v27_v5  ;;  %p463_p3 = por %p462_p2, %p461_p1 }
   0xe   :  { %426 = vmatprep.subr.bf16.mxu1 %v425_v13 }
   0xf   :  { %436 = vmatpush3.bf16.msra.mxu0 %v433_v19  ;;  %p464_p4 = pnand %p463_p3, %p457_p0 }
  0x10   :  { %438 = vmatprep.subr.bf16.mxu0 %v437_v22 }
  0x11   :  { %428 = vmatpush3.bf16.msra.mxu1 %v425_v13 }
  0x13   :  { %440 = vmatpush3.bf16.msra.mxu0 %v437_v22 }
  0x14   :  { %392 = vmatmul.mubr.msk.f32.vlgmr.msra.gmra.mrb[2].mxu1 %vm52_vm0, %v28_v12  ;;  %442 = vmatprep.subr.bf16.mxu0 %v441_v25 }
  0x17   :  { %444 = vmatpush3.bf16.msra.mxu0 %v441_v25 }
  0xdf   :  { %v382_v27 = vpop.f32.mrb[0].mxu1 }
  0xe0   :  { %v131_v28 = vadd.f32 %v382_v27, %v339_v26  ;;  %v125_v29 = vpop.f32.mrb[1].mxu1 }
  0xe1   :  { %v126_v30 = vadd.f32 %v339_v26, %v125_v29 }
  0xe2   :  { %v346_v31 = vmul.f32 -1.442695, %v131_v28 }
  0xe3   :  { %v345_v32 = vmul.f32 -1.442695, %v126_v30 }
  0xe4   :  { %448 = vpow2.f32 %v346_v31 }
  0xe5   :  { %450 = vpow2.f32 %v345_v32 }
  0xe7   :  { %v393_v33 = vpop.f32.mrb[2].mxu1 }
  0xe8   :  { %v207_v34 = vpop.f32.mrb[3].mxu1  ;;  %v213_v40 = vadd.f32 %v393_v33, %v342_v39 }
  0xe9   :  { %v208_v42 = vadd.f32 %v342_v39, %v207_v34 }
  0xee   :  { %v449_v35 = vpop.eup %448 }
  0xef   :  { %v451_v36 = vpop.eup %450  ;;  %v223_v37 = vadd.f32 1.0, %v449_v35 }
  0xf0   :  { %v222_v38 = vadd.f32 1.0, %v451_v36 }
  0xf1   :  { %452 = vrcp.f32 %v223_v37 }
  0xf2   :  { %454 = vrcp.f32 %v222_v38 }
  0xfb   :  { %v453_v41 = vpop.eup %452 }
  0xfc   :  { %v455_v43 = vpop.eup %454  ;;  %v229_v44 = vmul.f32 %v453_v41, %v131_v28 }
  0xfd   :  { %v228_v45 = vmul.f32 %v455_v43, %v126_v30 }
  0xfe   :  { %v231_v46 = vmul.f32 %v229_v44, %v213_v40 }
  0xff   :  { %v230_v47 = vmul.f32 %v228_v45, %v208_v42 }
 0x101   :  { %410 = vmatprep.mubr.msk.f32.mxu0 %vm239_vm1, %v230_v47 }
 0x102   :  { %411 = vmatmul.mubr.msk.f32.vlgmr.msra.gmra.mrb[0].mxu0 %vm239_vm1, %v231_v46 }
 0x1d5   :  { %v412_v49 = vpop.f32.mrb[0].mxu0 }
 0x1d6   :  { %v318_v50 = vadd.f32 %v412_v49, %v347_v48  ;;  %v312_v51 = vpop.f32.mrb[1].mxu0 }
 0x1d7   :  { %v313_v52 = vadd.f32 %v347_v48, %v312_v51 }
 0x1d8   :  { %322 = vst.msk [vmem:[#allocation2 + $0x8] sm:$0xff] %vm52_vm0, %v318_v50 }
 0x1d9   :  { %321 = vst.msk [vmem:[#allocation2] sm:$0xff] %vm52_vm0, %v313_v52 }
 0x1da   :  { %467 = shalt.err (!%p464_p4)
}
 0x1db   :  { %s468_s17 = scalar_lea.hbm %s611_s7, 256 }
 0x1dc   :  { %p469_p5 = scmp.ne.s32.totalorder %s611_s7, %s468_s17  ;;  %p472_p6 = scmp.lt.u32.totalorder %s468_s17, %s611_s7 }
 0x1de   :  { %p474_p7 = pnand %p472_p6, %p469_p5 }
 0x1e0   :  { %477 = shalt.err (!%p474_p7)
}
 0x1e1   :  { %s481_s3 = smov 128   ;;  %s482_s22 = smov 8  }
 0x1e2   :  { %334 = dma.vmem_to_hbm [thread:$0]  %s329_s15, 256, %s611_s7, [#allocation3], %s481_s3, %s481_s3, %s482_s22  }
 0x1e3   :  { %478 = dma.done.wait [#allocation3], 256  }
 0x1e4   :  { %479 = vsyncadd [#allocation3], 4294967040 }
 0x1e5   :  { %338 = vsyncpa [#allocation3], 1 }

</bundles_post_ra>
